<compile_context>
chip_gen: v7x
topology: tpu7x:2x2x1
jax: 0.10.0
libtpu: 0.0.40
codegen_flags: <defaults>
</compile_context>

<pallas_src>
import jax
import jax.numpy as jnp
from jax.experimental import pallas as pl
from jax.experimental.pallas import tpu as pltpu


def _round_up(n, m):
    return ((n + m - 1) // m) * m


def _make_qnet_kernel(din_p, h_p):
    """Build the kernel with static slab offsets baked in."""
    o_w1 = 0
    o_b1 = o_w1 + din_p      # all offsets are multiples of 8 (sublane aligned)
    o_w2 = o_b1 + 8
    o_b2 = o_w2 + h_p
    o_w3 = o_b2 + 8
    o_b3 = o_w3 + h_p

    def kernel(x_ref, p_ref, o_ref):
        x = x_ref[...]                                   # (TB, din_p)

        w1 = p_ref[o_w1:o_w1 + din_p, :]                 # (din_p, 128)
        b1 = p_ref[o_b1:o_b1 + 1, :]                     # (1, 128)
        w2 = p_ref[o_w2:o_w2 + h_p, :]                   # (128, 128)
        b2 = p_ref[o_b2:o_b2 + 1, :]
        w3 = p_ref[o_w3:o_w3 + h_p, :]                   # (128, 128)
        b3 = p_ref[o_b3:o_b3 + 1, :]

        # fc1 + ReLU
        h1 = jnp.dot(x, w1, preferred_element_type=jnp.float32) + b1
        h1 = jnp.maximum(h1, 0.0)
        # fc2 + ReLU
        h2 = jnp.dot(h1, w2, preferred_element_type=jnp.float32) + b2
        h2 = jnp.maximum(h2, 0.0)
        # fc3 (Q-values) -- full 128-lane store, sliced to out_dim outside
        out = jnp.dot(h2, w3, preferred_element_type=jnp.float32) + b3
        o_ref[...] = out.astype(o_ref.dtype)

    return kernel


def _pack_params(params, din_p, h_p, cols):
    """Pack all weights/biases (zero-padded to lane-dense shapes) into one slab."""
    def pad2(a, rows, c):
        a = a.reshape(a.shape[0] if a.ndim == 2 else 1, -1)
        r, cc = a.shape
        return jnp.pad(a.astype(jnp.float32), ((0, rows - r), (0, c - cc)))

    w1 = pad2(params["w1"], din_p, cols)
    b1 = pad2(params["b1"], 8, cols)
    w2 = pad2(params["w2"], h_p, cols)
    b2 = pad2(params["b2"], 8, cols)
    w3 = pad2(params["w3"], h_p, cols)
    b3 = pad2(params["b3"], 8, cols)
    return jnp.concatenate([w1, b1, w2, b2, w3, b3], axis=0)


def qnet_forward(x, params, block_b=512):
    """x: (B, input_dim) f32; params: dict w1,b1,w2,b2,w3,b3 (W as (in, out))."""
    B, din = x.shape
    hidden = params["w1"].shape[1]
    out_dim = params["w3"].shape[1]

    din_p = _round_up(din, 128)
    h_p = _round_up(hidden, 128)
    cols = h_p
    assert out_dim <= cols, "output_dim must fit in the padded hidden width"

    # Batch tiling: 8-row aligned tile, capped at block_b; pad batch to a multiple.
    tb = min(_round_up(block_b, 8), _round_up(B, 8))
    b_pad = _round_up(B, tb)

    x_p = jnp.pad(x.astype(jnp.float32), ((0, b_pad - B), (0, din_p - din)))
    slab = _pack_params(params, din_p, h_p, cols)
    n_rows = slab.shape[0]

    kernel = _make_qnet_kernel(din_p, h_p)

    out_padded = pl.pallas_call(
        kernel,
        out_shape=jax.ShapeDtypeStruct((b_pad, cols), jnp.float32),
        grid_spec=pl.GridSpec(
            grid=(b_pad // tb,),
            in_specs=[
                # activations: blocked along batch, double-buffered by the pipeline
                pl.BlockSpec((tb, din_p), lambda i: (i, 0)),
                # packed parameter slab: same block every step -> VMEM-resident
                pl.BlockSpec((n_rows, cols), lambda i: (0, 0)),
            ],
            out_specs=pl.BlockSpec((tb, cols), lambda i: (i, 0)),
        ),
        compiler_params=pltpu.CompilerParams(
            dimension_semantics=("parallel",),       # shard batch over TCs (v7x)
            vmem_limit_bytes=64 * 1024 * 1024,       # safe on v7x's 64 MiB VMEM
        ),
    )(x_p, slab)

    return out_padded[:B, :out_dim]


def init_params(key, input_dim, hidden, output_dim):
    """Deterministic init mimicking PyTorch Linear default (uniform +/- 1/sqrt(fan_in))."""
    ks = jax.random.split(key, 6)

    def linear(kw, kb, fan_in, fan_out):
        bound = 1.0 / jnp.sqrt(float(fan_in))
        w = jax.random.uniform(kw, (fan_in, fan_out), jnp.float32, -bound, bound)
        b = jax.random.uniform(kb, (1, fan_out), jnp.float32, -bound, bound)
        return w, b

    w1, b1 = linear(ks[0], ks[1], input_dim, hidden)
    w2, b2 = linear(ks[2], ks[3], hidden, hidden)
    w3, b3 = linear(ks[4], ks[5], hidden, output_dim)
    return {"w1": w1, "b1": b1, "w2": w2, "b2": b2, "w3": w3, "b3": b3}


def qnet_reference(x, p):
    h1 = jnp.maximum(x @ p["w1"] + p["b1"], 0.0)
    h2 = jnp.maximum(h1 @ p["w2"] + p["b2"], 0.0)
    return h2 @ p["w3"] + p["b3"]


if __name__ == "__main__":
    key = jax.random.PRNGKey(0)
    k_x, k_p = jax.random.split(key)

    batch = 8
    input_dim = 16   # observation dim
    hidden = 64      # fixed by the module
    output_dim = 4   # action dim

    x = jax.random.normal(k_x, (batch, input_dim), jnp.float32)
    params = init_params(k_p, input_dim, hidden, output_dim)

    q = qnet_forward(x, params)
    jax.block_until_ready(q)

    q_ref = qnet_reference(x, params)
    assert q.shape == (batch, output_dim)
    assert jnp.allclose(q, q_ref, atol=1e-4, rtol=1e-4)

    print("KERNEL_OK")
</pallas_src>

<mosaic_0001>
module attributes {stable_mosaic.version = 11 : i64} {
  func.func @kernel(%arg0: i32, %arg1: memref<8x128xf32, #tpu.memory_space<vmem>>, %arg2: memref<408x128xf32, #tpu.memory_space<vmem>>, %arg3: memref<8x128xf32, #tpu.memory_space<vmem>>) attributes {dimension_semantics = [#tpu.dimension_semantics<parallel>], iteration_bounds = array<i64: 1>, scalar_prefetch = 0 : i64, scratch_operands = 0 : i64, tpu.core_type = #tpu.core_type<tc>, window_params = [{transform_indices = @transform_0, window_bounds = array<i64: 8, 128>}, {pipeline_mode = #tpu.pipeline_mode<synchronous>, transform_indices = @transform_1, window_bounds = array<i64: 408, 128>}, {transform_indices = @transform_2, window_bounds = array<i64: 8, 128>}]} {
    %c0 = arith.constant 0 : index
    %c0_0 = arith.constant 0 : index
    %0 = vector.load %arg1[%c0, %c0_0] : memref<8x128xf32, #tpu.memory_space<vmem>>, vector<8x128xf32>
    %c0_1 = arith.constant 0 : index
    %c0_2 = arith.constant 0 : index
    %1 = vector.load %arg2[%c0_1, %c0_2] : memref<408x128xf32, #tpu.memory_space<vmem>>, vector<128x128xf32>
    %c128 = arith.constant 128 : index
    %c0_3 = arith.constant 0 : index
    %2 = vector.load %arg2[%c128, %c0_3] : memref<408x128xf32, #tpu.memory_space<vmem>>, vector<1x128xf32>
    %c136 = arith.constant 136 : index
    %c0_4 = arith.constant 0 : index
    %3 = vector.load %arg2[%c136, %c0_4] : memref<408x128xf32, #tpu.memory_space<vmem>>, vector<128x128xf32>
    %c264 = arith.constant 264 : index
    %c0_5 = arith.constant 0 : index
    %4 = vector.load %arg2[%c264, %c0_5] : memref<408x128xf32, #tpu.memory_space<vmem>>, vector<1x128xf32>
    %c272 = arith.constant 272 : index
    %c0_6 = arith.constant 0 : index
    %5 = vector.load %arg2[%c272, %c0_6] : memref<408x128xf32, #tpu.memory_space<vmem>>, vector<128x128xf32>
    %c400 = arith.constant 400 : index
    %c0_7 = arith.constant 0 : index
    %6 = vector.load %arg2[%c400, %c0_7] : memref<408x128xf32, #tpu.memory_space<vmem>>, vector<1x128xf32>
    %cst = arith.constant dense<0.000000e+00> : vector<8x128xf32>
    %7 = tpu.matmul %0, %1, %cst {dimension_numbers = #tpu.dot_dimension_numbers<[1], [0], [0], [1], [0, 0, 1, 1], [], []>} : vector<8x128xf32>, vector<128x128xf32>, vector<8x128xf32> -> vector<8x128xf32>
    %8 = vector.broadcast %2 : vector<1x128xf32> to vector<8x128xf32>
    %9 = arith.addf %7, %8 : vector<8x128xf32>
    %cst_8 = arith.constant 0.000000e+00 : f32
    %10 = vector.broadcast %cst_8 : f32 to vector<8x128xf32>
    %11 = arith.maximumf %9, %10 : vector<8x128xf32>
    %cst_9 = arith.constant dense<0.000000e+00> : vector<8x128xf32>
    %12 = tpu.matmul %11, %3, %cst_9 {dimension_numbers = #tpu.dot_dimension_numbers<[1], [0], [0], [1], [0, 0, 1, 1], [], []>} : vector<8x128xf32>, vector<128x128xf32>, vector<8x128xf32> -> vector<8x128xf32>
    %13 = vector.broadcast %4 : vector<1x128xf32> to vector<8x128xf32>
    %14 = arith.addf %12, %13 : vector<8x128xf32>
    %cst_10 = arith.constant 0.000000e+00 : f32
    %15 = vector.broadcast %cst_10 : f32 to vector<8x128xf32>
    %16 = arith.maximumf %14, %15 : vector<8x128xf32>
    %cst_11 = arith.constant dense<0.000000e+00> : vector<8x128xf32>
    %17 = tpu.matmul %16, %5, %cst_11 {dimension_numbers = #tpu.dot_dimension_numbers<[1], [0], [0], [1], [0, 0, 1, 1], [], []>} : vector<8x128xf32>, vector<128x128xf32>, vector<8x128xf32> -> vector<8x128xf32>
    %18 = vector.broadcast %6 : vector<1x128xf32> to vector<8x128xf32>
    %19 = arith.addf %17, %18 : vector<8x128xf32>
    %c0_12 = arith.constant 0 : index
    %c0_13 = arith.constant 0 : index
    %20 = vector.load %arg3[%c0_12, %c0_13] : memref<8x128xf32, #tpu.memory_space<vmem>>, vector<8x128xf32>
    tpu.vector_store %arg3[%c0_12, %c0_13], %19 {strides = array<i32>} : memref<8x128xf32, #tpu.memory_space<vmem>>, vector<8x128xf32>,
    return
  }
  func.func @transform_0(%arg0: i32) -> (i32, i32) {
    %c0_i32 = arith.constant 0 : i32
    %c0_i32_0 = arith.constant 0 : i32
    return %arg0, %c0_i32 : i32, i32
  }
  func.func @transform_1(%arg0: i32) -> (i32, i32) {
    %c0_i32 = arith.constant 0 : i32
    %c0_i32_0 = arith.constant 0 : i32
    %c0_i32_1 = arith.constant 0 : i32
    return %c0_i32, %c0_i32_0 : i32, i32
  }
  func.func @transform_2(%arg0: i32) -> (i32, i32) {
    %c0_i32 = arith.constant 0 : i32
    %c0_i32_0 = arith.constant 0 : i32
    return %arg0, %c0_i32 : i32, i32
  }
}

</mosaic_0001>

<bundles_post_ra>
// kernel: tpu_custom_call.1
= control target key start
LH: loop header
LB: loop body
LE: loop exit
PB: predicated region body
PF: predicated region fallthrough
CT: control target
= control target key end

     0   :  { %7 = vsyncpa [#allocation3], 0  ;;  %s738_s0 = inlined_call_operand.hbm [shape: f32[8,128], index: 0, kind: input, shape index: {}]   ;;  %s739_s1 = inlined_call_operand.hbm [shape: f32[408,128], index: 1, kind: input, shape index: {}]   ;;  %s740_s2 = inlined_call_operand.hbm [shape: f32[8,128], index: 2, kind: output, shape index: {}]  }
   0x1   :  { %8 = vsyncpa [#allocation6], 0 }
   0x2   :  { %9 = vsyncpa [#allocation4], 0  ;;  %s642_s9 = smov [#allocation2]   ;;  %s643_s11 = smov [#allocation5]  }
   0x3   :  { %s16_s10 = sshll.u32 %s642_s9, 4  ;;  %s25_s12 = sshll.u32 %s643_s11, 4  ;;  %s17_s10 = int_to_ptr.vmem [resolvable:$true] %s16_s10  ;;  %s665_s12 = int_to_ptr.vmem [resolvable:$true] %s25_s12 }
   0x4   :  { %s570_s15 = scalar_lea.hbm %s738_s0, 128 }
   0x5   :  { %p571_p0 = scmp.ne.s32.totalorder %s738_s0, %s570_s15  ;;  %p574_p1 = scmp.lt.u32.totalorder %s570_s15, %s738_s0 }
   0x7   :  { %p576_p2 = pnand %p574_p1, %p571_p0 }
   0x9   :  { %579 = shalt.err (!%p576_p2)
}
   0xa   :  { %s580_s20 = scalar_lea.vmem %s17_s10, 128  ;;  %p585_p4 = scmp.lt.s32.totalorder %s17_s10, %s17_s10 }
   0xb   :  { %p581_p3 = scmp.ne.s32.totalorder %s17_s10, %s580_s20  ;;  %p586_p5 = scmp.lt.s32.totalorder %s580_s20, %s580_s20 }
   0xd   :  { %p587_p6 = por %p586_p5, %p585_p4 }
   0xf   :  { %p588_p7 = pnand %p587_p6, %p581_p3 }
  0x11   :  { %591 = shalt.err (!%p588_p7)
}
  0x12   :  { %19 = dma.hbm_to_vmem [thread:$0]  %s738_s0, 128, %s17_s10, [#allocation3]  }
  0x13   :  { %s592_s25 = scalar_lea.hbm %s739_s1, 6528 }
  0x14   :  { %p593_p8 = scmp.ne.s32.totalorder %s739_s1, %s592_s25  ;;  %p596_p9 = scmp.lt.u32.totalorder %s592_s25, %s739_s1 }
  0x16   :  { %p598_p10 = pnand %p596_p9, %p593_p8 }
  0x18   :  { %601 = shalt.err (!%p598_p10)
}
  0x19   :  { %s602_s30 = scalar_lea.vmem %s665_s12, 6528  ;;  %p607_p12 = scmp.lt.s32.totalorder %s665_s12, %s665_s12 }
  0x1a   :  { %p603_p11 = scmp.ne.s32.totalorder %s665_s12, %s602_s30  ;;  %p608_p13 = scmp.lt.s32.totalorder %s602_s30, %s602_s30 }
  0x1c   :  { %p609_p0 = por %p608_p13, %p607_p12 }
  0x1e   :  { %p610_p1 = pnand %p609_p0, %p603_p11 }
  0x20   :  { %613 = shalt.err (!%p610_p1)
}
  0x21   :  { %s644_s0 = smov 128   ;;  %s645_s3 = smov 8  }
  0x22   :  { %31 = dma.hbm_to_vmem [thread:$0]  %s739_s1, 6528, %s665_s12, [#allocation6], %s644_s0, %s644_s0, %s645_s3  }
  0x23   :  { %636 = dma.done.wait [#allocation3], 128  }
  0x24   :  { %637 = vsyncadd [#allocation3], 4294967168 }
  0x25   :  { %638 = dma.done.wait [#allocation6], 6528  }
  0x26   :  { %639 = vsyncadd [#allocation6], 4294960768  ;;  %v646_v0 = vmov 0.0|0.0   ;;  %vm647_vm0 = vmmov 0   ;;  %v648_v1 = vmov 0.0   ;;  %v39_v2 = vld [vmem:[#allocation5] sm:$0xff] }
  0x27   :  { %490 = vmatprep.subr.bf16.mxu0 %v646_v0  ;;  %417 = vmatprep.mubr.msk.f32.mxu0 %vm647_vm0, %v648_v1  ;;  %v40_v3 = vld [vmem:[#allocation5 + $0x8] sm:$0xff]  ;;  %v41_v4 = vld [vmem:[#allocation5 + $0x10] sm:$0xff]  ;;  %v42_v6 = vld [vmem:[#allocation5 + $0x18] sm:$0xff]  ;;  %s649_s1 = smov [#allocation7]  }
  0x28   :  { %514 = vmatprep.subr.bf16.mxu1 %v646_v0  ;;  %452 = vmatprep.mubr.msk.f32.mxu1 %vm647_vm0, %v648_v1  ;;  %v491_v5 = vpack.c.bf16 %v40_v3, %v39_v2  ;;  %v494_v7 = vpack.c.bf16 %v42_v6, %v41_v4  ;;  %v43_v8 = vld [vmem:[#allocation5 + $0x20] sm:$0xff]  ;;  %v44_v9 = vld [vmem:[#allocation5 + $0x28] sm:$0xff]  ;;  %v57_v11 = vld [vmem:[#allocation5 + $0x90] sm:$0xff]  ;;  %s321_s6 = sshll.u32 %s649_s1, 4  ;;  %s322_s6 = int_to_ptr.vmem [resolvable:$true] %s321_s6 }
  0x29   :  { %v56_v10 = vld [vmem:[#allocation5 + $0x88] sm:$0xff]  ;;  %v58_v12 = vld [vmem:[#allocation5 + $0x98] sm:$0xff]  ;;  %v59_v13 = vld [vmem:[#allocation5 + $0xa0] sm:$0xff]  ;;  %v497_v14 = vpack.c.bf16 %v44_v9, %v43_v8  ;;  %s614_s7 = scalar_lea.vmem %s322_s6, 128  ;;  %p619_p3 = scmp.lt.s32.totalorder %s322_s6, %s322_s6 }
  0x2a   :  { %492 = vmatpush3.bf16.msra.mxu0 %v491_v5  ;;  %v515_v15 = vpack.c.bf16 %v57_v11, %v56_v10  ;;  %v45_v16 = vld [vmem:[#allocation5 + $0x30] sm:$0xff]  ;;  %v46_v17 = vld [vmem:[#allocation5 + $0x38] sm:$0xff]  ;;  %v518_v18 = vpack.c.bf16 %v59_v13, %v58_v12  ;;  %v60_v19 = vld [vmem:[#allocation5 + $0xa8] sm:$0xff]  ;;  %p615_p2 = scmp.ne.s32.totalorder %s322_s6, %s614_s7  ;;  %p620_p4 = scmp.lt.s32.totalorder %s614_s7, %s614_s7 }
  0x2b   :  { %493 = vmatprep.subr.bf16.mxu0 %v646_v0  ;;  %v61_v20 = vld [vmem:[#allocation5 + $0xb0] sm:$0xff]  ;;  %v500_v21 = vpack.c.bf16 %v46_v17, %v45_v16  ;;  %v47_v22 = vld [vmem:[#allocation5 + $0x40] sm:$0xff]  ;;  %v48_v23 = vld [vmem:[#allocation5 + $0x48] sm:$0xff] }
  0x2c   :  { %516 = vmatpush3.bf16.msra.mxu1 %v515_v15  ;;  %v521_v24 = vpack.c.bf16 %v61_v20, %v60_v19  ;;  %v62_v25 = vld [vmem:[#allocation5 + $0xb8] sm:$0xff]  ;;  %v63_v26 = vld [vmem:[#allocation5 + $0xc0] sm:$0xff]  ;;  %v503_v27 = vpack.c.bf16 %v48_v23, %v47_v22  ;;  %v49_v28 = vld [vmem:[#allocation5 + $0x50] sm:$0xff]  ;;  %p621_p5 = por %p620_p4, %p619_p3 }
  0x2d   :  { %517 = vmatprep.subr.bf16.mxu1 %v646_v0  ;;  %v50_v29 = vld [vmem:[#allocation5 + $0x58] sm:$0xff]  ;;  %v524_v30 = vpack.c.bf16 %v63_v26, %v62_v25  ;;  %v64_v31 = vld [vmem:[#allocation5 + $0xc8] sm:$0xff]  ;;  %v65_v32 = vld [vmem:[#allocation5 + $0xd0] sm:$0xff] }
  0x2e   :  { %495 = vmatpush3.bf16.msra.mxu0 %v494_v7  ;;  %v506_v33 = vpack.c.bf16 %v50_v29, %v49_v28  ;;  %v51_v34 = vld [vmem:[#allocation5 + $0x60] sm:$0xff]  ;;  %v52_v35 = vld [vmem:[#allocation5 + $0x68] sm:$0xff]  ;;  %v527_v36 = vpack.c.bf16 %v65_v32, %v64_v31  ;;  %v66_v37 = vld [vmem:[#allocation5 + $0xd8] sm:$0xff]  ;;  %p622_p6 = pnand %p621_p5, %p615_p2 }
  0x2f   :  { %496 = vmatprep.subr.bf16.mxu0 %v646_v0  ;;  %v67_v38 = vld [vmem:[#allocation5 + $0xe0] sm:$0xff]  ;;  %v509_v39 = vpack.c.bf16 %v52_v35, %v51_v34  ;;  %v53_v40 = vld [vmem:[#allocation5 + $0x70] sm:$0xff]  ;;  %v54_v41 = vld [vmem:[#allocation5 + $0x78] sm:$0xff] }
  0x30   :  { %519 = vmatpush3.bf16.msra.mxu1 %v518_v18  ;;  %v530_v42 = vpack.c.bf16 %v67_v38, %v66_v37  ;;  %v68_v43 = vld [vmem:[#allocation5 + $0xe8] sm:$0xff]  ;;  %v69_v44 = vld [vmem:[#allocation5 + $0xf0] sm:$0xff]  ;;  %v512_v45 = vpack.c.bf16 %v54_v41, %v53_v40  ;;  %v38_v47 = vld [vmem:[#allocation2] sm:$0xff] }
  0x31   :  { %520 = vmatprep.subr.bf16.mxu1 %v646_v0  ;;  %v533_v46 = vpack.c.bf16 %v69_v44, %v68_v43  ;;  %v70_v48 = vld [vmem:[#allocation5 + $0xf8] sm:$0xff]  ;;  %v71_v49 = vld [vmem:[#allocation5 + $0x100] sm:$0xff]  ;;  %v73_v51 = vld [vmem:[#allocation5 + $0x110] sm:$0xff] }
  0x32   :  { %498 = vmatpush3.bf16.msra.mxu0 %v497_v14  ;;  %v536_v50 = vpack.c.bf16 %v71_v49, %v70_v48  ;;  %v74_v52 = vld [vmem:[#allocation5 + $0x118] sm:$0xff]  ;;  %v75_v53 = vld [vmem:[#allocation5 + $0x120] sm:$0xff]  ;;  %v76_v55 = vld [vmem:[#allocation5 + $0x128] sm:$0xff] }
  0x33   :  { %499 = vmatprep.subr.bf16.mxu0 %v646_v0  ;;  %v539_v54 = vpack.c.bf16 %v74_v52, %v73_v51  ;;  %v542_v56 = vpack.c.bf16 %v76_v55, %v75_v53  ;;  %v77_v57 = vld [vmem:[#allocation5 + $0x130] sm:$0xff]  ;;  %v78_v58 = vld [vmem:[#allocation5 + $0x138] sm:$0xff]  ;;  %v79_v60 = vld [vmem:[#allocation5 + $0x140] sm:$0xff] }
  0x34   :  { %522 = vmatpush3.bf16.msra.mxu1 %v521_v24  ;;  %v545_v59 = vpack.c.bf16 %v78_v58, %v77_v57  ;;  %v80_v61 = vld [vmem:[#allocation5 + $0x148] sm:$0xff]  ;;  %v81_v63 = vld [vmem:[#allocation5 + $0x150] sm:$0xff]  ;;  %v83_v3 = vld [vmem:[#allocation5 + $0x160] sm:$0xff] }
  0x35   :  { %523 = vmatprep.subr.bf16.mxu1 %v646_v0  ;;  %v548_v62 = vpack.c.bf16 %v80_v61, %v79_v60  ;;  %v84_v4 = vld [vmem:[#allocation5 + $0x168] sm:$0xff]  ;;  %v85_v6 = vld [vmem:[#allocation5 + $0x170] sm:$0xff]  ;;  %v86_v7 = vld [vmem:[#allocation5 + $0x178] sm:$0xff] }
  0x36   :  { %501 = vmatpush3.bf16.msra.mxu0 %v500_v21  ;;  %v554_v5 = vpack.c.bf16 %v84_v4, %v83_v3  ;;  %v557_v8 = vpack.c.bf16 %v86_v7, %v85_v6  ;;  %v331_v9 = vld [vmem:[#allocation5 + $0x80] ss:$0 sm:$0xff]  ;;  %v88_v15 = vld [vmem:[#allocation5 + $0x188] sm:$0xff]  ;;  %v333_v22 = vld [vmem:[#allocation5 + $0x190] ss:$0 sm:$0xff] }
  0x37   :  { %502 = vmatprep.subr.bf16.mxu0 %v646_v0  ;;  %v87_v14 = vld [vmem:[#allocation5 + $0x180] sm:$0xff]  ;;  %v332_v17 = vld [vmem:[#allocation5 + $0x108] ss:$0 sm:$0xff] }
  0x38   :  { %525 = vmatpush3.bf16.msra.mxu1 %v524_v30  ;;  %v560_v16 = vpack.c.bf16 %v88_v15, %v87_v14 }
  0x39   :  { %526 = vmatprep.subr.bf16.mxu1 %v646_v0 }
  0x3a   :  { %504 = vmatpush3.bf16.msra.mxu0 %v503_v27 }
  0x3b   :  { %505 = vmatprep.subr.bf16.mxu0 %v646_v0 }
  0x3c   :  { %528 = vmatpush3.bf16.msra.mxu1 %v527_v36 }
  0x3d   :  { %529 = vmatprep.subr.bf16.mxu1 %v646_v0 }
  0x3e   :  { %507 = vmatpush3.bf16.msra.mxu0 %v506_v33 }
  0x3f   :  { %508 = vmatprep.subr.bf16.mxu0 %v646_v0 }
  0x40   :  { %531 = vmatpush3.bf16.msra.mxu1 %v530_v42 }
  0x41   :  { %532 = vmatprep.subr.bf16.mxu1 %v646_v0 }
  0x42   :  { %510 = vmatpush3.bf16.msra.mxu0 %v509_v39 }
  0x43   :  { %511 = vmatprep.subr.bf16.mxu0 %v646_v0 }
  0x44   :  { %534 = vmatpush3.bf16.msra.mxu1 %v533_v46 }
  0x45   :  { %535 = vmatprep.subr.bf16.mxu1 %v646_v0 }
  0x46   :  { %513 = vmatpush3.bf16.msra.mxu0 %v512_v45 }
  0x47   :  { %538 = vmatprep.subr.bf16.mxu0 %v646_v0 }
  0x48   :  { %537 = vmatpush3.bf16.msra.mxu1 %v536_v50 }
  0x49   :  { %418 = vmatmul.mubr.f32.vlgmr.msra.gmra.mrb[0].mxu0 %v38_v47 }
  0x4a   :  { %487 = vmatprep.mubr.msk.f32.mxu0 %vm647_vm0, %v648_v1  ;;  %540 = vmatpush3.bf16.msra.mxu0 %v539_v54  ;;  %v82_v1 = vld [vmem:[#allocation5 + $0x158] sm:$0xff] }
  0x4b   :  { %541 = vmatprep.subr.bf16.mxu0 %v646_v0  ;;  %v551_v2 = vpack.c.bf16 %v82_v1, %v81_v63 }
  0x4e   :  { %543 = vmatpush3.bf16.msra.mxu0 %v542_v56 }
  0x4f   :  { %544 = vmatprep.subr.bf16.mxu0 %v646_v0 }
  0x52   :  { %546 = vmatpush3.bf16.msra.mxu0 %v545_v59 }
  0x53   :  { %547 = vmatprep.subr.bf16.mxu0 %v646_v0 }
  0x56   :  { %549 = vmatpush3.bf16.msra.mxu0 %v548_v62 }
  0x57   :  { %550 = vmatprep.subr.bf16.mxu0 %v646_v0 }
  0x5a   :  { %552 = vmatpush3.bf16.msra.mxu0 %v551_v2 }
  0x5b   :  { %553 = vmatprep.subr.bf16.mxu0 %v646_v0 }
  0x5e   :  { %555 = vmatpush3.bf16.msra.mxu0 %v554_v5 }
  0x5f   :  { %556 = vmatprep.subr.bf16.mxu0 %v646_v0 }
  0x62   :  { %558 = vmatpush3.bf16.msra.mxu0 %v557_v8 }
  0x63   :  { %559 = vmatprep.subr.bf16.mxu0 %v646_v0 }
  0x66   :  { %561 = vmatpush3.bf16.msra.mxu0 %v560_v16 }
 0x11c   :  { %v160_v10 = vpop.f32.mrb[0].mxu0 }
 0x11d   :  { %v161_v11 = vadd.f32 %v331_v9, %v160_v10  ;;  %v419_v12 = vpop.f32.mrb[1].mxu0 }
 0x11f   :  { %v164_v13 = vmax.f32 %v161_v11, 0.0 }
 0x121   :  { %453 = vmatmul.mubr.f32.vlgmr.msra.gmra.mrb[0].mxu1 %v164_v13 }
 0x1f4   :  { %v235_v18 = vpop.f32.mrb[0].mxu1 }
 0x1f5   :  { %v236_v19 = vadd.f32 %v332_v17, %v235_v18  ;;  %v454_v20 = vpop.f32.mrb[1].mxu1 }
 0x1f7   :  { %v239_v21 = vmax.f32 %v236_v19, 0.0 }
 0x1f9   :  { %488 = vmatmul.mubr.f32.vlgmr.msra.gmra.mrb[2].mxu0 %v239_v21 }
 0x2cc   :  { %v310_v0 = vpop.f32.mrb[2].mxu0 }
 0x2cd   :  { %v311_v23 = vadd.f32 %v333_v22, %v310_v0  ;;  %v489_v24 = vpop.f32.mrb[3].mxu0 }
 0x2cf   :  { %314 = vst [vmem:[#allocation7] sm:$0xff] %v311_v23 }
 0x2d0   :  { %625 = shalt.err (!%p622_p6)
}
 0x2d1   :  { %s626_s10 = scalar_lea.hbm %s740_s2, 128 }
 0x2d2   :  { %p627_p7 = scmp.ne.s32.totalorder %s740_s2, %s626_s10  ;;  %p630_p8 = scmp.lt.u32.totalorder %s626_s10, %s740_s2 }
 0x2d4   :  { %p632_p9 = pnand %p630_p8, %p627_p7 }
 0x2d6   :  { %635 = shalt.err (!%p632_p9)
}
 0x2d7   :  { %324 = dma.vmem_to_hbm [thread:$0]  %s322_s6, 128, %s740_s2, [#allocation4]  }
 0x2d8   :  { %640 = dma.done.wait [#allocation4], 128  }
 0x2d9   :  { %641 = vsyncadd [#allocation4], 4294967168 }
 0x2da   :  { %328 = vsyncpa [#allocation3], 1 }
 0x2db   :  { %329 = vsyncpa [#allocation6], 1 }
 0x2dc   :  { %330 = vsyncpa [#allocation4], 1 }

</bundles_post_ra>
